<compile_context>
chip_gen: v7x
topology: tpu7x:2x2x1
jax: 0.10.0
libtpu: 0.0.40
codegen_flags: <defaults>
</compile_context>

<pallas_src>
import jax
import jax.numpy as jnp
from jax.experimental import pallas as pl
from jax.experimental.pallas import tpu as pltpu


_LANE = 128
_SMALL_BYTES = 512 * 1024        # below this: single gridless whole-array block
_DEFAULT_TILE_BYTES = 2 << 20    # conservative per-buffer tile (v5e-safe)
_MIN_TILE_BYTES = 256 * 1024     # don't shrink tiles below this


# ----------------------------------------------------------------------------
# Hot path: exact forward semantics of GlobalModel (nn.Identity on `u`).
# ----------------------------------------------------------------------------
def global_model_forward(x, edge_index, edge_attr, u, batch):
    """Pallas-project equivalent of GlobalModel.forward.

    global_mlp is nn.Identity(), so the forward pass is a zero-cost
    pass-through of `u`.  No kernel launch, no HBM traffic.
    """
    del x, edge_index, edge_attr, batch  # unused, as in the reference module
    return u


# ----------------------------------------------------------------------------
# Materialized-copy path (only if a caller explicitly needs an independent
# output buffer).
# ----------------------------------------------------------------------------
def _identity_copy_kernel(u_ref, o_ref):
    # Pure element-wise pass-through of the resident VMEM block.
    o_ref[...] = u_ref[...]


def _sublane_pack(dtype) -> int:
    # Rows per packed sublane group: 8 for 32-bit, 16 for bf16, 32 for int8/fp8.
    itemsize = jnp.dtype(dtype).itemsize
    return 8 * max(1, 4 // itemsize)


def _per_buffer_tile_target_bytes() -> int:
    """Generation-aware per-buffer tile target.

    v7x: HBM ~3.2 TB/s -> 2 MiB tiles are only ~0.6 us of DMA, so the
         ~0.35 us per-grid-step overhead dominates; use ~8 MiB tiles
         (2 bufs x (in+out) = 32 MiB still fits the 32 MiB scoped / 64 MiB
         physical VMEM).
    v6e: ~4 MiB.
    v5e: scoped-VMEM default is only 16 MiB and DMA is slow enough that
         2 MiB tiles already hide the step overhead; keep 2 MiB.
    """
    try:
        kind = jax.devices()[0].device_kind.lower()
    except Exception:
        return _DEFAULT_TILE_BYTES
    if "v7" in kind or "tpu7" in kind:
        return 8 << 20
    if "v6" in kind:
        return 4 << 20
    return _DEFAULT_TILE_BYTES   # v5e and older


def _choose_block(n: int, pack: int, target: int) -> int:
    """Block extent: either the full dim (n <= pack) or a multiple of `pack`
    near `target`, never exceeding the packed extent of the array.  Partial
    tail blocks are handled by grid = cdiv(n, block)."""
    if n <= pack:
        return n                              # equals full dim -> rule satisfied
    target = max(pack, (target // pack) * pack)
    full_packed = (n // pack) * pack          # largest multiple of pack <= n
    return min(target, full_packed)


def _gridless_copy(u):
    # Single whole-array VMEM block: minimal Mosaic program (one DMA in,
    # one DMA out).  Only used for small arrays where pipelining buys nothing.
    return pl.pallas_call(
        _identity_copy_kernel,
        out_shape=jax.ShapeDtypeStruct(u.shape, u.dtype),
        in_specs=[pl.BlockSpec(memory_space=pltpu.MemorySpace.VMEM)],
        out_specs=pl.BlockSpec(memory_space=pltpu.MemorySpace.VMEM),
    )(u)


def global_model_forward_copy(u, *, donate: bool = False):
    """Materialized identity copy of `u` via a minimal Pallas kernel.

    donate=True: an aliased copy is bit-identical to the input buffer, so we
    skip the kernel (and its 2x total_bytes of HBM traffic) and return `u`
    directly — callers that donate their buffer get the identity path.
    """
    if donate:
        return u

    if u.ndim != 2:
        # TODO(synk): large non-2D `u` would need its own tiling; the module
        # only ever passes a 2-D (num_graphs, emb_dim) tensor.
        return _gridless_copy(u)

    n_rows, n_cols = u.shape
    itemsize = jnp.dtype(u.dtype).itemsize
    total_bytes = n_rows * n_cols * itemsize

    if total_bytes <= _SMALL_BYTES:
        return _gridless_copy(u)

    row_pack = _sublane_pack(u.dtype)

    # Per-buffer tile byte target: generation-aware, but keep at least ~4 grid
    # steps on mid-sized arrays so input/output DMAs overlap (full duplex).
    min_tile = max(_MIN_TILE_BYTES, row_pack * _LANE * itemsize)
    tile_target = max(min_tile,
                      min(_per_buffer_tile_target_bytes(), total_bytes // 4))

    # Columns: keep the full (lane-dense) width when a block of row_pack rows
    # fits the budget; otherwise tile columns in multiples of 128.
    bytes_per_row = n_cols * itemsize
    if bytes_per_row <= tile_target or n_cols <= _LANE:
        block_cols = n_cols
    else:
        cols_target = max(_LANE, tile_target // (row_pack * itemsize))
        block_cols = _choose_block(n_cols, _LANE, cols_target)

    # Rows: fixed multiple-of-row_pack block, partial last block via cdiv grid
    # (no exact-divisor search).
    rows_target = max(row_pack, tile_target // (block_cols * itemsize))
    block_rows = _choose_block(n_rows, row_pack, rows_target)

    block_bytes = block_rows * block_cols * itemsize
    # Double-buffered input + output = 4x the tile bytes, plus headroom.
    vmem_limit = int(4 * block_bytes + (8 << 20))

    grid = (pl.cdiv(n_rows, block_rows), pl.cdiv(n_cols, block_cols))
    return pl.pallas_call(
        _identity_copy_kernel,
        out_shape=jax.ShapeDtypeStruct(u.shape, u.dtype),
        grid=grid,
        in_specs=[pl.BlockSpec((block_rows, block_cols), lambda i, j: (i, j))],
        out_specs=pl.BlockSpec((block_rows, block_cols), lambda i, j: (i, j)),
        compiler_params=pltpu.CompilerParams(
            dimension_semantics=("parallel", "parallel"),
            vmem_limit_bytes=vmem_limit),
    )(u)


if __name__ == "__main__":
    key = jax.random.PRNGKey(0)
    k_x, k_ea, k_u, k_big, k_odd = jax.random.split(key, 5)

    # Small, self-consistent GNN-style shapes:
    num_nodes = 16      # node count
    num_edges = 32      # edge count
    node_feat = 8       # node feature dim
    edge_feat = 4       # edge feature dim
    num_graphs = 2      # graphs in the batch
    emb_dim = 32        # global (u) embedding dim

    x = jax.random.normal(k_x, (num_nodes, node_feat), dtype=jnp.float32)
    edge_index = jnp.zeros((2, num_edges), dtype=jnp.int32)
    edge_attr = jax.random.normal(k_ea, (num_edges, edge_feat), dtype=jnp.float32)
    u = jax.random.normal(k_u, (num_graphs, emb_dim), dtype=jnp.float32)
    batch = jnp.concatenate(
        [jnp.zeros((num_nodes // 2,), jnp.int32),
         jnp.ones((num_nodes // 2,), jnp.int32)]
    )

    # 1) Hot path: pure identity, no kernel launch.
    out = global_model_forward(x, edge_index, edge_attr, u, batch)
    out = jax.block_until_ready(out)
    assert out.shape == u.shape and out.dtype == u.dtype
    assert bool(jnp.array_equal(out, u))

    # 2) Materialized copy (small -> gridless whole-array Pallas kernel).
    out_copy = jax.block_until_ready(global_model_forward_copy(u))
    assert out_copy.shape == u.shape and out_copy.dtype == u.dtype
    assert bool(jnp.array_equal(out_copy, u))

    # 3) donate=True: no kernel, no HBM round trip — bit-identical pass-through.
    out_don = jax.block_until_ready(global_model_forward_copy(u, donate=True))
    assert out_don.shape == u.shape and out_don.dtype == u.dtype
    assert bool(jnp.array_equal(out_don, u))

    # 4) Tiled path on a large lane-dense `u` (8 MiB f32): fixed-size blocks,
    #    cdiv grid, generation-aware tile bytes.
    big_rows, big_cols = 4096, 512
    u_big = jax.random.normal(k_big, (big_rows, big_cols), dtype=jnp.float32)
    out_big = jax.block_until_ready(global_model_forward_copy(u_big))
    assert out_big.shape == u_big.shape and out_big.dtype == u_big.dtype
    assert bool(jnp.array_equal(out_big, u_big))

    # 5) Tiled path on an awkward/irregular shape (rows not a multiple of 8,
    #    cols not a multiple of 128): partial tail block + full-width lanes.
    odd_rows, odd_cols = 1000, 300
    u_odd = jax.random.normal(k_odd, (odd_rows, odd_cols), dtype=jnp.float32)
    out_odd = jax.block_until_ready(global_model_forward_copy(u_odd))
    assert out_odd.shape == u_odd.shape and out_odd.dtype == u_odd.dtype
    assert bool(jnp.array_equal(out_odd, u_odd))

    print("KERNEL_OK")
</pallas_src>

<mosaic_0001>
module attributes {stable_mosaic.version = 11 : i64} {
  func.func @_identity_copy_kernel(%arg0: memref<2x32xf32, #tpu.memory_space<vmem>>, %arg1: memref<2x32xf32, #tpu.memory_space<vmem>>) attributes {dimension_semantics = [], scalar_prefetch = 0 : i64, scratch_operands = 0 : i64, tpu.core_type = #tpu.core_type<tc>} {
    %c0 = arith.constant 0 : index
    %c0_0 = arith.constant 0 : index
    %0 = vector.load %arg0[%c0, %c0_0] : memref<2x32xf32, #tpu.memory_space<vmem>>, vector<2x32xf32>
    %c0_1 = arith.constant 0 : index
    %c0_2 = arith.constant 0 : index
    %1 = vector.load %arg1[%c0_1, %c0_2] : memref<2x32xf32, #tpu.memory_space<vmem>>, vector<2x32xf32>
    tpu.vector_store %arg1[%c0_1, %c0_2], %0 {strides = array<i32>} : memref<2x32xf32, #tpu.memory_space<vmem>>, vector<2x32xf32>,
    return
  }
}

</mosaic_0001>

<bundles_post_ra>
// kernel: tpu_custom_call.1
= control target key start
LH: loop header
LB: loop body
LE: loop exit
PB: predicated region body
PF: predicated region fallthrough
CT: control target
= control target key end

     0   :  { %6 = vsyncpa [#allocation3], 0  ;;  %s125_s0 = inlined_call_operand.hbm [shape: f32[2,32], index: 0, kind: input, shape index: {}]   ;;  %s126_s1 = inlined_call_operand.hbm [shape: f32[2,32], index: 1, kind: output, shape index: {}]  }
   0x1   :  { %7 = vsyncpa [#allocation4], 0  ;;  %s89_s6 = smov [#allocation2]   ;;  %s41_s10 = scalar_lea.hbm %s125_s0, 32 }
   0x2   :  { %s14_s7 = sshll.u32 %s89_s6, 4  ;;  %p42_p0 = scmp.ne.s32.totalorder %s125_s0, %s41_s10  ;;  %s15_s7 = int_to_ptr.vmem [resolvable:$true] %s14_s7 }
   0x3   :  { %p45_p1 = scmp.lt.u32.totalorder %s41_s10, %s125_s0 }
   0x5   :  { %p47_p2 = pnand %p45_p1, %p42_p0 }
   0x7   :  { %50 = shalt.err (!%p47_p2)
}
   0x8   :  { %s51_s15 = scalar_lea.vmem %s15_s7, 32  ;;  %p56_p4 = scmp.lt.s32.totalorder %s15_s7, %s15_s7 }
   0x9   :  { %p52_p3 = scmp.ne.s32.totalorder %s15_s7, %s51_s15  ;;  %p57_p5 = scmp.lt.s32.totalorder %s51_s15, %s51_s15 }
   0xb   :  { %p58_p6 = por %p57_p5, %p56_p4 }
   0xd   :  { %p59_p7 = pnand %p58_p6, %p52_p3 }
   0xf   :  { %62 = shalt.err (!%p59_p7)
}
  0x10   :  { %17 = dma.hbm_to_vmem [thread:$0]  %s125_s0, 32, %s15_s7, [#allocation3]  }
  0x11   :  { %85 = dma.done.wait [#allocation3], 32  }
  0x12   :  { %86 = vsyncadd [#allocation3], 4294967264  ;;  %s90_s18 = smov [#allocation5]   ;;  %vm22_vm0 = vcmask 254976   ;;  %v21_v0 = vld [vmem:[#allocation2] sm:$0x3] }
  0x13   :  { %s30_s19 = sshll.u32 %s90_s18, 4  ;;  %23 = vst.msk [vmem:[#allocation5] sm:$0x3] %vm22_vm0, %v21_v0  ;;  %s31_s19 = int_to_ptr.vmem [resolvable:$true] %s30_s19 }
  0x14   :  { %s63_s20 = scalar_lea.vmem %s31_s19, 32  ;;  %p68_p9 = scmp.lt.s32.totalorder %s31_s19, %s31_s19 }
  0x15   :  { %p64_p8 = scmp.ne.s32.totalorder %s31_s19, %s63_s20  ;;  %p69_p10 = scmp.lt.s32.totalorder %s63_s20, %s63_s20 }
  0x17   :  { %p70_p11 = por %p69_p10, %p68_p9 }
  0x19   :  { %p71_p12 = pnand %p70_p11, %p64_p8 }
  0x1b   :  { %74 = shalt.err (!%p71_p12)
}
  0x1c   :  { %s75_s23 = scalar_lea.hbm %s126_s1, 32 }
  0x1d   :  { %p76_p13 = scmp.ne.s32.totalorder %s126_s1, %s75_s23  ;;  %p79_p0 = scmp.lt.u32.totalorder %s75_s23, %s126_s1 }
  0x1f   :  { %p81_p1 = pnand %p79_p0, %p76_p13 }
  0x21   :  { %84 = shalt.err (!%p81_p1)
}
  0x22   :  { %33 = dma.vmem_to_hbm [thread:$0]  %s31_s19, 32, %s126_s1, [#allocation4]  }
  0x23   :  { %87 = dma.done.wait [#allocation4], 32  }
  0x24   :  { %88 = vsyncadd [#allocation4], 4294967264 }
  0x25   :  { %37 = vsyncpa [#allocation3], 1 }
  0x26   :  { %38 = vsyncpa [#allocation4], 1 }

</bundles_post_ra>
